<compile_context>
chip_gen: v6e
topology: v6e:2x2x1
jax: 0.10.0
libtpu: 0.0.40
codegen_flags: <defaults>
</compile_context>

<pallas_src>
import functools

import jax
import jax.numpy as jnp
from jax import lax
from jax.experimental import pallas as pl
from jax.experimental.pallas import tpu as pltpu

NEG_SLOPE = 0.2
EPS = 1e-5


def _round_up(v, m):
    return (v + m - 1) // m * m


def _leaky(h):
    return jnp.where(h >= 0, h, NEG_SLOPE * h)


def _shift_cols(h, offset):
    """s[:, t] = h[:, t + offset], zero-filled where t + offset is out of range.

    `offset` is a small static Python int (|offset| <= pad << T), so this is a
    lane shift plus a tiny zero concat — no (K*Cp, T+2*pad) temporary.
    """
    if offset == 0:
        return h
    Cp, T = h.shape
    z = jnp.zeros((Cp, abs(offset)), h.dtype)
    if offset > 0:
        return jnp.concatenate([h[:, offset:], z], axis=1)
    return jnp.concatenate([z, h[:, :T + offset]], axis=1)


def _conv_same(h, w_ref, *, K, dilation, pad, matmul_dtype):
    """Dilated SAME 1-D conv as K accumulated (Cp,Cp)@(Cp,T) MXU matmuls."""
    hm = h.astype(matmul_dtype)
    acc = None
    for k in range(K):
        o = k * dilation - pad
        t = jnp.dot(w_ref[k], _shift_cols(hm, o),
                    preferred_element_type=jnp.float32)
        acc = t if acc is None else acc + t
    return acc


def _col_mask(T, L_valid):
    idx = lax.broadcasted_iota(jnp.int32, (1, T), 1)
    return (idx < L_valid).astype(jnp.float32)


def _stats(h):
    s = jnp.sum(h, axis=1, keepdims=True)
    sq = jnp.sum(h * h, axis=1, keepdims=True)
    return jnp.concatenate([s, sq], axis=1)            # (Cp, 2)


# ----------------------------- kernel bodies --------------------------------

def _conv1_stats_kernel(x_ref, w1_ref, st_ref, *,
                        K, dilation, pad, L_valid, matmul_dtype):
    """Pass 1: conv1 on one batch tile -> per-tile sum / sum-of-squares only."""
    T = x_ref.shape[-1]
    h1 = _conv_same(x_ref[0], w1_ref, K=K, dilation=dilation, pad=pad,
                    matmul_dtype=matmul_dtype)
    h1 = h1 * _col_mask(T, L_valid)      # keep padded tail columns out of stats
    st_ref[0] = _stats(h1)


def _bn1_conv2_stats_kernel(x_ref, w1_ref, w2_ref, aff1_ref, h2_ref, st_ref, *,
                            K, dilation, pad, L_valid, matmul_dtype):
    """Pass 2: recompute conv1, BN1 affine + LeakyReLU, conv2, h2 + stats."""
    T = x_ref.shape[-1]
    v = _col_mask(T, L_valid)
    h1 = _conv_same(x_ref[0], w1_ref, K=K, dilation=dilation, pad=pad,
                    matmul_dtype=matmul_dtype)
    # BN1 (folded affine) + activation; zero the padded tail so conv2's window
    # sees true zeros beyond the valid length (SAME-padding semantics).
    h1a = _leaky(aff1_ref[:, 0:1] * h1 + aff1_ref[:, 1:2]) * v
    h2 = _conv_same(h1a, w2_ref, K=K, dilation=dilation, pad=pad,
                    matmul_dtype=matmul_dtype) * v
    h2_ref[0] = h2
    st_ref[0] = _stats(h2)


def _bn2_residual_kernel(h2_ref, x_ref, aff2_ref, o_ref):
    """Pass 3: BN2 affine + residual add + LeakyReLU, output in (N, Cp, Lr)."""
    o_ref[0] = _leaky(aff2_ref[:, 0:1] * h2_ref[0] + aff2_ref[:, 1:2] + x_ref[0])


# ------------------------------- wrapper -------------------------------------

def residual_block(x, params, *, dilation=1, kernel_size=3,
                   matmul_dtype=jnp.bfloat16):
    """x: (N, C, L) float32.  params: (w1, b1, g1, be1, w2, b2, g2, be2) with
    w*: (C, C, K) (PyTorch OIH layout), vectors: (C,).

    matmul_dtype=bf16 (default) uses bf16 MXU inputs with f32 accumulation;
    pass jnp.float32 when bit-level accuracy matters.
    """
    N, C, L = x.shape
    K = kernel_size
    d = dilation
    pad = d * (K - 1) // 2

    sub = 8 if matmul_dtype == jnp.float32 else 16   # sublane granule
    Cp = max(_round_up(C, sub), sub)                 # NOT padded to 128
    Lr = _round_up(L, 128)                           # lane-dense segment
    T = Lr

    w1, b1, g1, be1, w2, b2, g2, be2 = params
    del b1, b2        # conv biases cancel exactly through training-mode BN
    f32 = jnp.float32

    # Weights: (C_out, C_in, K) -> (K, Cp, Cp), pre-cast to the MXU input dtype.
    def pack_w(w):
        wt = jnp.transpose(w.astype(f32), (2, 0, 1))        # (K, Co, Ci)
        wt = jnp.pad(wt, ((0, 0), (0, Cp - C), (0, Cp - C)))
        return wt.astype(matmul_dtype)

    w1k, w2k = pack_w(w1), pack_w(w2)

    # Activations stay in their natural (N, C, L) layout, zero-padded.
    xp = jnp.pad(x.astype(f32), ((0, 0), (0, Cp - C), (0, Lr - L)))

    pad_vec = lambda g: jnp.pad(g.astype(f32), (0, Cp - C))
    g1p, be1p, g2p, be2p = pad_vec(g1), pad_vec(be1), pad_vec(g2), pad_vec(be2)

    inv_count = 1.0 / float(N * L)
    cparams = pltpu.CompilerParams(dimension_semantics=("parallel",))

    batch_map = lambda n: (n, 0, 0)
    rep3 = lambda n: (0, 0, 0)
    rep2 = lambda n: (0, 0)

    x_spec = pl.BlockSpec((1, Cp, T), batch_map)         # streamed batch tiles
    w_spec = pl.BlockSpec((K, Cp, Cp), rep3)             # resident weights
    aff_spec = pl.BlockSpec((Cp, 2), rep2)               # resident scale/shift
    st_spec = pl.BlockSpec((1, Cp, 2), batch_map)
    st_shape = jax.ShapeDtypeStruct((N, Cp, 2), f32)

    conv_kw = dict(K=K, dilation=d, pad=pad, L_valid=L, matmul_dtype=matmul_dtype)

    # ---- pass 1: conv1 -> stats only (h1 never hits HBM) ---------------------
    st1 = pl.pallas_call(
        functools.partial(_conv1_stats_kernel, **conv_kw),
        grid=(N,),
        in_specs=[x_spec, w_spec],
        out_specs=st_spec,
        out_shape=st_shape,
        compiler_params=cparams,
    )(xp, w1k)

    def affine(stats, gamma, beta):
        # Combine per-tile sums -> per-channel scale/shift (tiny glue math).
        s = jnp.sum(stats, axis=0)                          # (Cp, 2)
        mean = s[:, 0] * inv_count
        var = jnp.maximum(s[:, 1] * inv_count - mean * mean, 0.0)
        scale = gamma * lax.rsqrt(var + EPS)
        shift = beta - scale * mean
        return jnp.stack([scale, shift], axis=1)            # (Cp, 2)

    aff1 = affine(st1, g1p, be1p)

    # ---- pass 2: conv1 (recomputed) + BN1 + LeakyReLU + conv2 + stats --------
    h2raw, st2 = pl.pallas_call(
        functools.partial(_bn1_conv2_stats_kernel, **conv_kw),
        grid=(N,),
        in_specs=[x_spec, w_spec, w_spec, aff_spec],
        out_specs=(x_spec, st_spec),
        out_shape=(jax.ShapeDtypeStruct((N, Cp, Lr), f32), st_shape),
        compiler_params=cparams,
    )(xp, w1k, w2k, aff1)

    aff2 = affine(st2, g2p, be2p)

    # ---- pass 3: BN2 affine + residual + LeakyReLU ---------------------------
    y = pl.pallas_call(
        _bn2_residual_kernel,
        grid=(N,),
        in_specs=[x_spec, x_spec, aff_spec],
        out_specs=x_spec,
        out_shape=jax.ShapeDtypeStruct((N, Cp, Lr), f32),
        compiler_params=cparams,
    )(h2raw, xp, aff2)

    return y[:, :C, :L]


# --------------------------- pure-JAX reference ------------------------------

def residual_block_ref(x, params, *, dilation=1, kernel_size=3, eps=EPS):
    w1, b1, g1, be1, w2, b2, g2, be2 = params
    padding = dilation * (kernel_size - 1) // 2

    def conv(h, w, b):
        y = lax.conv_general_dilated(
            h, w, window_strides=(1,), padding=[(padding, padding)],
            rhs_dilation=(dilation,), dimension_numbers=("NCH", "OIH", "NCH"))
        return y + b[None, :, None]

    def bn(h, g, be):
        m = h.mean(axis=(0, 2), keepdims=True)
        v = ((h - m) ** 2).mean(axis=(0, 2), keepdims=True)
        return g[None, :, None] * (h - m) / jnp.sqrt(v + eps) + be[None, :, None]

    def lrelu(h):
        return jnp.where(h >= 0, h, NEG_SLOPE * h)

    h = lrelu(bn(conv(x, w1, b1), g1, be1))
    h = bn(conv(h, w2, b2), g2, be2)
    return lrelu(h + x)


if __name__ == "__main__":
    N, C, L = 2, 4, 16
    kernel_size, dilation = 3, 2

    key = jax.random.PRNGKey(0)
    ks = jax.random.split(key, 9)
    x = jax.random.normal(ks[0], (N, C, L), jnp.float32)

    w1 = 0.3 * jax.random.normal(ks[1], (C, C, kernel_size), jnp.float32)
    b1 = 0.1 * jax.random.normal(ks[2], (C,), jnp.float32)
    g1 = 1.0 + 0.1 * jax.random.normal(ks[3], (C,), jnp.float32)
    be1 = 0.1 * jax.random.normal(ks[4], (C,), jnp.float32)
    w2 = 0.3 * jax.random.normal(ks[5], (C, C, kernel_size), jnp.float32)
    b2 = 0.1 * jax.random.normal(ks[6], (C,), jnp.float32)
    g2 = 1.0 + 0.1 * jax.random.normal(ks[7], (C,), jnp.float32)
    be2 = 0.1 * jax.random.normal(ks[8], (C,), jnp.float32)
    params = (w1, b1, g1, be1, w2, b2, g2, be2)

    ref = residual_block_ref(x, params, dilation=dilation,
                             kernel_size=kernel_size)

    # f32 MXU path: bit-accurate check.
    fn_f32 = jax.jit(functools.partial(residual_block, dilation=dilation,
                                       kernel_size=kernel_size,
                                       matmul_dtype=jnp.float32))
    out_f32 = jax.block_until_ready(fn_f32(x, params))
    assert out_f32.shape == (N, C, L) and out_f32.dtype == jnp.float32
    err32 = jnp.max(jnp.abs(out_f32 - ref))
    assert jnp.allclose(out_f32, ref, rtol=2e-4, atol=2e-4), f"f32 err = {err32}"

    # Default bf16-MXU path (f32 accumulation): looser tolerance by design.
    fn_bf16 = jax.jit(functools.partial(residual_block, dilation=dilation,
                                        kernel_size=kernel_size))
    out_bf16 = jax.block_until_ready(fn_bf16(x, params))
    assert out_bf16.shape == (N, C, L) and out_bf16.dtype == jnp.float32
    err16 = jnp.max(jnp.abs(out_bf16 - ref))
    assert jnp.allclose(out_bf16, ref, rtol=5e-2, atol=5e-2), f"bf16 err = {err16}"

    print("KERNEL_OK")
</pallas_src>

<mosaic_0001>
module attributes {stable_mosaic.version = 11 : i64} {
  func.func @_conv1_stats_kernel(%arg0: i32, %arg1: memref<1x8x128xf32, #tpu.memory_space<vmem>>, %arg2: memref<3x8x8xf32, #tpu.memory_space<vmem>>, %arg3: memref<1x8x2xf32, #tpu.memory_space<vmem>>) attributes {dimension_semantics = [#tpu.dimension_semantics<parallel>], iteration_bounds = array<i64: 2>, scalar_prefetch = 0 : i64, scratch_operands = 0 : i64, tpu.core_type = #tpu.core_type<tc>, window_params = [{transform_indices = @transform_0, window_bounds = array<i64: 1, 8, 128>}, {pipeline_mode = #tpu.pipeline_mode<synchronous>, transform_indices = @transform_1, window_bounds = array<i64: 3, 8, 8>}, {transform_indices = @transform_2, window_bounds = array<i64: 1, 8, 2>}]} {
    %c0 = arith.constant 0 : index
    %c0_0 = arith.constant 0 : index
    %c0_1 = arith.constant 0 : index
    %0 = vector.load %arg1[%c0, %c0_0, %c0_1] : memref<1x8x128xf32, #tpu.memory_space<vmem>>, vector<1x8x128xf32>
    %1 = vector.shape_cast %0 : vector<1x8x128xf32> to vector<8x128xf32>
    %c0_2 = arith.constant 0 : index
    %c0_3 = arith.constant 0 : index
    %c0_4 = arith.constant 0 : index
    %2 = vector.load %arg2[%c0_2, %c0_3, %c0_4] : memref<3x8x8xf32, #tpu.memory_space<vmem>>, vector<1x8x8xf32>
    %3 = vector.shape_cast %2 : vector<1x8x8xf32> to vector<8x8xf32>
    %cst = arith.constant 0.000000e+00 : f32
    %4 = vector.broadcast %cst : f32 to vector<8x2xf32>
    %5 = vector.extract_strided_slice %1 {offsets = [0, 0], sizes = [8, 126], strides = [1, 1]} : vector<8x128xf32> to vector<8x126xf32>
    %6 = tpu.concatenate %4, %5 in 1 : vector<8x2xf32>, vector<8x126xf32> -> vector<8x128xf32>
    %cst_5 = arith.constant dense<0.000000e+00> : vector<8x128xf32>
    %7 = tpu.matmul %3, %6, %cst_5 {dimension_numbers = #tpu.dot_dimension_numbers<[1], [0], [0], [1], [0, 0, 1, 1], [], []>} : vector<8x8xf32>, vector<8x128xf32>, vector<8x128xf32> -> vector<8x128xf32>
    %c1 = arith.constant 1 : index
    %c0_6 = arith.constant 0 : index
    %c0_7 = arith.constant 0 : index
    %8 = vector.load %arg2[%c1, %c0_6, %c0_7] : memref<3x8x8xf32, #tpu.memory_space<vmem>>, vector<1x8x8xf32>
    %9 = vector.shape_cast %8 : vector<1x8x8xf32> to vector<8x8xf32>
    %cst_8 = arith.constant dense<0.000000e+00> : vector<8x128xf32>
    %10 = tpu.matmul %9, %1, %cst_8 {dimension_numbers = #tpu.dot_dimension_numbers<[1], [0], [0], [1], [0, 0, 1, 1], [], []>} : vector<8x8xf32>, vector<8x128xf32>, vector<8x128xf32> -> vector<8x128xf32>
    %11 = arith.addf %7, %10 : vector<8x128xf32>
    %c2 = arith.constant 2 : index
    %c0_9 = arith.constant 0 : index
    %c0_10 = arith.constant 0 : index
    %12 = vector.load %arg2[%c2, %c0_9, %c0_10] : memref<3x8x8xf32, #tpu.memory_space<vmem>>, vector<1x8x8xf32>
    %13 = vector.shape_cast %12 : vector<1x8x8xf32> to vector<8x8xf32>
    %cst_11 = arith.constant 0.000000e+00 : f32
    %14 = vector.broadcast %cst_11 : f32 to vector<8x2xf32>
    %15 = vector.extract_strided_slice %1 {offsets = [0, 2], sizes = [8, 126], strides = [1, 1]} : vector<8x128xf32> to vector<8x126xf32>
    %16 = tpu.concatenate %15, %14 in 1 : vector<8x126xf32>, vector<8x2xf32> -> vector<8x128xf32>
    %cst_12 = arith.constant dense<0.000000e+00> : vector<8x128xf32>
    %17 = tpu.matmul %13, %16, %cst_12 {dimension_numbers = #tpu.dot_dimension_numbers<[1], [0], [0], [1], [0, 0, 1, 1], [], []>} : vector<8x8xf32>, vector<8x128xf32>, vector<8x128xf32> -> vector<8x128xf32>
    %18 = arith.addf %11, %17 : vector<8x128xf32>
    %19 = tpu.iota {dimensions = array<i32: 1>} : vector<1x128xi32>
    %c16_i32 = arith.constant 16 : i32
    %20 = vector.broadcast %c16_i32 : i32 to vector<1x128xi32>
    %21 = arith.cmpi slt, %19, %20 : vector<1x128xi32>
    %22 = arith.extui %21 : vector<1x128xi1> to vector<1x128xi32>
    %23 = arith.sitofp %22 : vector<1x128xi32> to vector<1x128xf32>
    %24 = vector.broadcast %23 : vector<1x128xf32> to vector<8x128xf32>
    %25 = arith.mulf %18, %24 : vector<8x128xf32>
    %cst_13 = arith.constant dense<0.000000e+00> : vector<8xf32>
    %26 = vector.multi_reduction <add>, %25, %cst_13 [1] : vector<8x128xf32> to vector<8xf32>
    %27 = vector.shape_cast %26 : vector<8xf32> to vector<8x1xf32>
    %28 = arith.mulf %25, %25 : vector<8x128xf32>
    %cst_14 = arith.constant dense<0.000000e+00> : vector<8xf32>
    %29 = vector.multi_reduction <add>, %28, %cst_14 [1] : vector<8x128xf32> to vector<8xf32>
    %30 = vector.shape_cast %29 : vector<8xf32> to vector<8x1xf32>
    %31 = tpu.concatenate %27, %30 in 1 : vector<8x1xf32>, vector<8x1xf32> -> vector<8x2xf32>
    %c0_15 = arith.constant 0 : index
    %c0_16 = arith.constant 0 : index
    %c0_17 = arith.constant 0 : index
    %32 = vector.load %arg3[%c0_15, %c0_16, %c0_17] : memref<1x8x2xf32, #tpu.memory_space<vmem>>, vector<1x8x2xf32>
    %33 = vector.shape_cast %32 : vector<1x8x2xf32> to vector<8x2xf32>
    %34 = vector.shape_cast %31 : vector<8x2xf32> to vector<1x8x2xf32>
    tpu.vector_store %arg3[%c0_15, %c0_16, %c0_17], %34 {strides = array<i32>} : memref<1x8x2xf32, #tpu.memory_space<vmem>>, vector<1x8x2xf32>,
    return
  }
  func.func @transform_0(%arg0: i32) -> (i32, i32, i32) {
    %c0_i32 = arith.constant 0 : i32
    %c0_i32_0 = arith.constant 0 : i32
    %c0_i32_1 = arith.constant 0 : i32
    return %arg0, %c0_i32, %c0_i32_0 : i32, i32, i32
  }
  func.func @transform_1(%arg0: i32) -> (i32, i32, i32) {
    %c0_i32 = arith.constant 0 : i32
    %c0_i32_0 = arith.constant 0 : i32
    %c0_i32_1 = arith.constant 0 : i32
    %c0_i32_2 = arith.constant 0 : i32
    return %c0_i32, %c0_i32_0, %c0_i32_1 : i32, i32, i32
  }
  func.func @transform_2(%arg0: i32) -> (i32, i32, i32) {
    %c0_i32 = arith.constant 0 : i32
    %c0_i32_0 = arith.constant 0 : i32
    %c0_i32_1 = arith.constant 0 : i32
    return %arg0, %c0_i32, %c0_i32_0 : i32, i32, i32
  }
}

module attributes {stable_mosaic.version = 11 : i64} {
  func.func @_bn2_residual_kernel(%arg0: i32, %arg1: memref<1x8x128xf32, #tpu.memory_space<vmem>>, %arg2: memref<1x8x128xf32, #tpu.memory_space<vmem>>, %arg3: memref<8x2xf32, #tpu.memory_space<vmem>>, %arg4: memref<1x8x128xf32, #tpu.memory_space<vmem>>) attributes {dimension_semantics = [#tpu.dimension_semantics<parallel>], iteration_bounds = array<i64: 2>, scalar_prefetch = 0 : i64, scratch_operands = 0 : i64, tpu.core_type = #tpu.core_type<tc>, window_params = [{transform_indices = @transform_0, window_bounds = array<i64: 1, 8, 128>}, {transform_indices = @transform_1, window_bounds = array<i64: 1, 8, 128>}, {pipeline_mode = #tpu.pipeline_mode<synchronous>, transform_indices = @transform_2, window_bounds = array<i64: 8, 2>}, {transform_indices = @transform_3, window_bounds = array<i64: 1, 8, 128>}]} {
    %c0 = arith.constant 0 : index
    %c0_0 = arith.constant 0 : index
    %0 = vector.load %arg3[%c0, %c0_0] : memref<8x2xf32, #tpu.memory_space<vmem>>, vector<8x1xf32>
    %c0_1 = arith.constant 0 : index
    %c0_2 = arith.constant 0 : index
    %c0_3 = arith.constant 0 : index
    %1 = vector.load %arg1[%c0_1, %c0_2, %c0_3] : memref<1x8x128xf32, #tpu.memory_space<vmem>>, vector<1x8x128xf32>
    %2 = vector.shape_cast %1 : vector<1x8x128xf32> to vector<8x128xf32>
    %3 = vector.broadcast %0 : vector<8x1xf32> to vector<8x128xf32>
    %4 = arith.mulf %3, %2 : vector<8x128xf32>
    %c0_4 = arith.constant 0 : index
    %c1 = arith.constant 1 : index
    %5 = vector.load %arg3[%c0_4, %c1] : memref<8x2xf32, #tpu.memory_space<vmem>>, vector<8x1xf32>
    %6 = vector.broadcast %5 : vector<8x1xf32> to vector<8x128xf32>
    %7 = arith.addf %4, %6 : vector<8x128xf32>
    %c0_5 = arith.constant 0 : index
    %c0_6 = arith.constant 0 : index
    %c0_7 = arith.constant 0 : index
    %8 = vector.load %arg2[%c0_5, %c0_6, %c0_7] : memref<1x8x128xf32, #tpu.memory_space<vmem>>, vector<1x8x128xf32>
    %9 = vector.shape_cast %8 : vector<1x8x128xf32> to vector<8x128xf32>
    %10 = arith.addf %7, %9 : vector<8x128xf32>
    %cst = arith.constant 0.000000e+00 : f32
    %11 = vector.broadcast %cst : f32 to vector<8x128xf32>
    %12 = arith.cmpf oge, %10, %11 : vector<8x128xf32>
    %cst_8 = arith.constant 2.000000e-01 : f32
    %13 = vector.broadcast %cst_8 : f32 to vector<8x128xf32>
    %14 = arith.mulf %13, %10 : vector<8x128xf32>
    %15 = arith.select %12, %10, %14 : vector<8x128xi1>, vector<8x128xf32>
    %c0_9 = arith.constant 0 : index
    %c0_10 = arith.constant 0 : index
    %c0_11 = arith.constant 0 : index
    %16 = vector.load %arg4[%c0_9, %c0_10, %c0_11] : memref<1x8x128xf32, #tpu.memory_space<vmem>>, vector<1x8x128xf32>
    %17 = vector.shape_cast %16 : vector<1x8x128xf32> to vector<8x128xf32>
    %18 = vector.shape_cast %15 : vector<8x128xf32> to vector<1x8x128xf32>
    tpu.vector_store %arg4[%c0_9, %c0_10, %c0_11], %18 {strides = array<i32>} : memref<1x8x128xf32, #tpu.memory_space<vmem>>, vector<1x8x128xf32>,
    return
  }
  func.func @transform_0(%arg0: i32) -> (i32, i32, i32) {
    %c0_i32 = arith.constant 0 : i32
    %c0_i32_0 = arith.constant 0 : i32
    %c0_i32_1 = arith.constant 0 : i32
    return %arg0, %c0_i32, %c0_i32_0 : i32, i32, i32
  }
  func.func @transform_1(%arg0: i32) -> (i32, i32, i32) {
    %c0_i32 = arith.constant 0 : i32
    %c0_i32_0 = arith.constant 0 : i32
    %c0_i32_1 = arith.constant 0 : i32
    return %arg0, %c0_i32, %c0_i32_0 : i32, i32, i32
  }
  func.func @transform_2(%arg0: i32) -> (i32, i32) {
    %c0_i32 = arith.constant 0 : i32
    %c0_i32_0 = arith.constant 0 : i32
    %c0_i32_1 = arith.constant 0 : i32
    return %c0_i32, %c0_i32_0 : i32, i32
  }
  func.func @transform_3(%arg0: i32) -> (i32, i32, i32) {
    %c0_i32 = arith.constant 0 : i32
    %c0_i32_0 = arith.constant 0 : i32
    %c0_i32_1 = arith.constant 0 : i32
    return %arg0, %c0_i32, %c0_i32_0 : i32, i32, i32
  }
}

module attributes {stable_mosaic.version = 11 : i64} {
  func.func @_bn1_conv2_stats_kernel(%arg0: i32, %arg1: memref<1x8x128xf32, #tpu.memory_space<vmem>>, %arg2: memref<3x8x8xf32, #tpu.memory_space<vmem>>, %arg3: memref<3x8x8xf32, #tpu.memory_space<vmem>>, %arg4: memref<8x2xf32, #tpu.memory_space<vmem>>, %arg5: memref<1x8x128xf32, #tpu.memory_space<vmem>>, %arg6: memref<1x8x2xf32, #tpu.memory_space<vmem>>) attributes {dimension_semantics = [#tpu.dimension_semantics<parallel>], iteration_bounds = array<i64: 2>, scalar_prefetch = 0 : i64, scratch_operands = 0 : i64, tpu.core_type = #tpu.core_type<tc>, window_params = [{transform_indices = @transform_0, window_bounds = array<i64: 1, 8, 128>}, {pipeline_mode = #tpu.pipeline_mode<synchronous>, transform_indices = @transform_1, window_bounds = array<i64: 3, 8, 8>}, {pipeline_mode = #tpu.pipeline_mode<synchronous>, transform_indices = @transform_2, window_bounds = array<i64: 3, 8, 8>}, {pipeline_mode = #tpu.pipeline_mode<synchronous>, transform_indices = @transform_3, window_bounds = array<i64: 8, 2>}, {transform_indices = @transform_4, window_bounds = array<i64: 1, 8, 128>}, {transform_indices = @transform_5, window_bounds = array<i64: 1, 8, 2>}]} {
    %0 = tpu.iota {dimensions = array<i32: 1>} : vector<1x128xi32>
    %c16_i32 = arith.constant 16 : i32
    %1 = vector.broadcast %c16_i32 : i32 to vector<1x128xi32>
    %2 = arith.cmpi slt, %0, %1 : vector<1x128xi32>
    %3 = arith.extui %2 : vector<1x128xi1> to vector<1x128xi32>
    %4 = arith.sitofp %3 : vector<1x128xi32> to vector<1x128xf32>
    %c0 = arith.constant 0 : index
    %c0_0 = arith.constant 0 : index
    %c0_1 = arith.constant 0 : index
    %5 = vector.load %arg1[%c0, %c0_0, %c0_1] : memref<1x8x128xf32, #tpu.memory_space<vmem>>, vector<1x8x128xf32>
    %6 = vector.shape_cast %5 : vector<1x8x128xf32> to vector<8x128xf32>
    %c0_2 = arith.constant 0 : index
    %c0_3 = arith.constant 0 : index
    %c0_4 = arith.constant 0 : index
    %7 = vector.load %arg2[%c0_2, %c0_3, %c0_4] : memref<3x8x8xf32, #tpu.memory_space<vmem>>, vector<1x8x8xf32>
    %8 = vector.shape_cast %7 : vector<1x8x8xf32> to vector<8x8xf32>
    %cst = arith.constant 0.000000e+00 : f32
    %9 = vector.broadcast %cst : f32 to vector<8x2xf32>
    %10 = vector.extract_strided_slice %6 {offsets = [0, 0], sizes = [8, 126], strides = [1, 1]} : vector<8x128xf32> to vector<8x126xf32>
    %11 = tpu.concatenate %9, %10 in 1 : vector<8x2xf32>, vector<8x126xf32> -> vector<8x128xf32>
    %cst_5 = arith.constant dense<0.000000e+00> : vector<8x128xf32>
    %12 = tpu.matmul %8, %11, %cst_5 {dimension_numbers = #tpu.dot_dimension_numbers<[1], [0], [0], [1], [0, 0, 1, 1], [], []>} : vector<8x8xf32>, vector<8x128xf32>, vector<8x128xf32> -> vector<8x128xf32>
    %c1 = arith.constant 1 : index
    %c0_6 = arith.constant 0 : index
    %c0_7 = arith.constant 0 : index
    %13 = vector.load %arg2[%c1, %c0_6, %c0_7] : memref<3x8x8xf32, #tpu.memory_space<vmem>>, vector<1x8x8xf32>
    %14 = vector.shape_cast %13 : vector<1x8x8xf32> to vector<8x8xf32>
    %cst_8 = arith.constant dense<0.000000e+00> : vector<8x128xf32>
    %15 = tpu.matmul %14, %6, %cst_8 {dimension_numbers = #tpu.dot_dimension_numbers<[1], [0], [0], [1], [0, 0, 1, 1], [], []>} : vector<8x8xf32>, vector<8x128xf32>, vector<8x128xf32> -> vector<8x128xf32>
    %16 = arith.addf %12, %15 : vector<8x128xf32>
    %c2 = arith.constant 2 : index
    %c0_9 = arith.constant 0 : index
    %c0_10 = arith.constant 0 : index
    %17 = vector.load %arg2[%c2, %c0_9, %c0_10] : memref<3x8x8xf32, #tpu.memory_space<vmem>>, vector<1x8x8xf32>
    %18 = vector.shape_cast %17 : vector<1x8x8xf32> to vector<8x8xf32>
    %cst_11 = arith.constant 0.000000e+00 : f32
    %19 = vector.broadcast %cst_11 : f32 to vector<8x2xf32>
    %20 = vector.extract_strided_slice %6 {offsets = [0, 2], sizes = [8, 126], strides = [1, 1]} : vector<8x128xf32> to vector<8x126xf32>
    %21 = tpu.concatenate %20, %19 in 1 : vector<8x126xf32>, vector<8x2xf32> -> vector<8x128xf32>
    %cst_12 = arith.constant dense<0.000000e+00> : vector<8x128xf32>
    %22 = tpu.matmul %18, %21, %cst_12 {dimension_numbers = #tpu.dot_dimension_numbers<[1], [0], [0], [1], [0, 0, 1, 1], [], []>} : vector<8x8xf32>, vector<8x128xf32>, vector<8x128xf32> -> vector<8x128xf32>
    %23 = arith.addf %16, %22 : vector<8x128xf32>
    %c0_13 = arith.constant 0 : index
    %c0_14 = arith.constant 0 : index
    %24 = vector.load %arg4[%c0_13, %c0_14] : memref<8x2xf32, #tpu.memory_space<vmem>>, vector<8x1xf32>
    %25 = vector.broadcast %24 : vector<8x1xf32> to vector<8x128xf32>
    %26 = arith.mulf %25, %23 : vector<8x128xf32>
    %c0_15 = arith.constant 0 : index
    %c1_16 = arith.constant 1 : index
    %27 = vector.load %arg4[%c0_15, %c1_16] : memref<8x2xf32, #tpu.memory_space<vmem>>, vector<8x1xf32>
    %28 = vector.broadcast %27 : vector<8x1xf32> to vector<8x128xf32>
    %29 = arith.addf %26, %28 : vector<8x128xf32>
    %cst_17 = arith.constant 0.000000e+00 : f32
    %30 = vector.broadcast %cst_17 : f32 to vector<8x128xf32>
    %31 = arith.cmpf oge, %29, %30 : vector<8x128xf32>
    %cst_18 = arith.constant 2.000000e-01 : f32
    %32 = vector.broadcast %cst_18 : f32 to vector<8x128xf32>
    %33 = arith.mulf %32, %29 : vector<8x128xf32>
    %34 = arith.select %31, %29, %33 : vector<8x128xi1>, vector<8x128xf32>
    %35 = vector.broadcast %4 : vector<1x128xf32> to vector<8x128xf32>
    %36 = arith.mulf %34, %35 : vector<8x128xf32>
    %c0_19 = arith.constant 0 : index
    %c0_20 = arith.constant 0 : index
    %c0_21 = arith.constant 0 : index
    %37 = vector.load %arg3[%c0_19, %c0_20, %c0_21] : memref<3x8x8xf32, #tpu.memory_space<vmem>>, vector<1x8x8xf32>
    %38 = vector.shape_cast %37 : vector<1x8x8xf32> to vector<8x8xf32>
    %cst_22 = arith.constant 0.000000e+00 : f32
    %39 = vector.broadcast %cst_22 : f32 to vector<8x2xf32>
    %40 = vector.extract_strided_slice %36 {offsets = [0, 0], sizes = [8, 126], strides = [1, 1]} : vector<8x128xf32> to vector<8x126xf32>
    %41 = tpu.concatenate %39, %40 in 1 : vector<8x2xf32>, vector<8x126xf32> -> vector<8x128xf32>
    %cst_23 = arith.constant dense<0.000000e+00> : vector<8x128xf32>
    %42 = tpu.matmul %38, %41, %cst_23 {dimension_numbers = #tpu.dot_dimension_numbers<[1], [0], [0], [1], [0, 0, 1, 1], [], []>} : vector<8x8xf32>, vector<8x128xf32>, vector<8x128xf32> -> vector<8x128xf32>
    %c1_24 = arith.constant 1 : index
    %c0_25 = arith.constant 0 : index
    %c0_26 = arith.constant 0 : index
    %43 = vector.load %arg3[%c1_24, %c0_25, %c0_26] : memref<3x8x8xf32, #tpu.memory_space<vmem>>, vector<1x8x8xf32>
    %44 = vector.shape_cast %43 : vector<1x8x8xf32> to vector<8x8xf32>
    %cst_27 = arith.constant dense<0.000000e+00> : vector<8x128xf32>
    %45 = tpu.matmul %44, %36, %cst_27 {dimension_numbers = #tpu.dot_dimension_numbers<[1], [0], [0], [1], [0, 0, 1, 1], [], []>} : vector<8x8xf32>, vector<8x128xf32>, vector<8x128xf32> -> vector<8x128xf32>
    %46 = arith.addf %42, %45 : vector<8x128xf32>
    %c2_28 = arith.constant 2 : index
    %c0_29 = arith.constant 0 : index
    %c0_30 = arith.constant 0 : index
    %47 = vector.load %arg3[%c2_28, %c0_29, %c0_30] : memref<3x8x8xf32, #tpu.memory_space<vmem>>, vector<1x8x8xf32>
    %48 = vector.shape_cast %47 : vector<1x8x8xf32> to vector<8x8xf32>
    %cst_31 = arith.constant 0.000000e+00 : f32
    %49 = vector.broadcast %cst_31 : f32 to vector<8x2xf32>
    %50 = vector.extract_strided_slice %36 {offsets = [0, 2], sizes = [8, 126], strides = [1, 1]} : vector<8x128xf32> to vector<8x126xf32>
    %51 = tpu.concatenate %50, %49 in 1 : vector<8x126xf32>, vector<8x2xf32> -> vector<8x128xf32>
    %cst_32 = arith.constant dense<0.000000e+00> : vector<8x128xf32>
    %52 = tpu.matmul %48, %51, %cst_32 {dimension_numbers = #tpu.dot_dimension_numbers<[1], [0], [0], [1], [0, 0, 1, 1], [], []>} : vector<8x8xf32>, vector<8x128xf32>, vector<8x128xf32> -> vector<8x128xf32>
    %53 = arith.addf %46, %52 : vector<8x128xf32>
    %54 = vector.broadcast %4 : vector<1x128xf32> to vector<8x128xf32>
    %55 = arith.mulf %53, %54 : vector<8x128xf32>
    %c0_33 = arith.constant 0 : index
    %c0_34 = arith.constant 0 : index
    %c0_35 = arith.constant 0 : index
    %56 = vector.load %arg5[%c0_33, %c0_34, %c0_35] : memref<1x8x128xf32, #tpu.memory_space<vmem>>, vector<1x8x128xf32>
    %57 = vector.shape_cast %56 : vector<1x8x128xf32> to vector<8x128xf32>
    %58 = vector.shape_cast %55 : vector<8x128xf32> to vector<1x8x128xf32>
    tpu.vector_store %arg5[%c0_33, %c0_34, %c0_35], %58 {strides = array<i32>} : memref<1x8x128xf32, #tpu.memory_space<vmem>>, vector<1x8x128xf32>,
    %cst_36 = arith.constant dense<0.000000e+00> : vector<8xf32>
    %59 = vector.multi_reduction <add>, %55, %cst_36 [1] : vector<8x128xf32> to vector<8xf32>
    %60 = vector.shape_cast %59 : vector<8xf32> to vector<8x1xf32>
    %61 = arith.mulf %55, %55 : vector<8x128xf32>
    %cst_37 = arith.constant dense<0.000000e+00> : vector<8xf32>
    %62 = vector.multi_reduction <add>, %61, %cst_37 [1] : vector<8x128xf32> to vector<8xf32>
    %63 = vector.shape_cast %62 : vector<8xf32> to vector<8x1xf32>
    %64 = tpu.concatenate %60, %63 in 1 : vector<8x1xf32>, vector<8x1xf32> -> vector<8x2xf32>
    %c0_38 = arith.constant 0 : index
    %c0_39 = arith.constant 0 : index
    %c0_40 = arith.constant 0 : index
    %65 = vector.load %arg6[%c0_38, %c0_39, %c0_40] : memref<1x8x2xf32, #tpu.memory_space<vmem>>, vector<1x8x2xf32>
    %66 = vector.shape_cast %65 : vector<1x8x2xf32> to vector<8x2xf32>
    %67 = vector.shape_cast %64 : vector<8x2xf32> to vector<1x8x2xf32>
    tpu.vector_store %arg6[%c0_38, %c0_39, %c0_40], %67 {strides = array<i32>} : memref<1x8x2xf32, #tpu.memory_space<vmem>>, vector<1x8x2xf32>,
    return
  }
  func.func @transform_0(%arg0: i32) -> (i32, i32, i32) {
    %c0_i32 = arith.constant 0 : i32
    %c0_i32_0 = arith.constant 0 : i32
    %c0_i32_1 = arith.constant 0 : i32
    return %arg0, %c0_i32, %c0_i32_0 : i32, i32, i32
  }
  func.func @transform_1(%arg0: i32) -> (i32, i32, i32) {
    %c0_i32 = arith.constant 0 : i32
    %c0_i32_0 = arith.constant 0 : i32
    %c0_i32_1 = arith.constant 0 : i32
    %c0_i32_2 = arith.constant 0 : i32
    return %c0_i32, %c0_i32_0, %c0_i32_1 : i32, i32, i32
  }
  func.func @transform_2(%arg0: i32) -> (i32, i32, i32) {
    %c0_i32 = arith.constant 0 : i32
    %c0_i32_0 = arith.constant 0 : i32
    %c0_i32_1 = arith.constant 0 : i32
    %c0_i32_2 = arith.constant 0 : i32
    return %c0_i32, %c0_i32_0, %c0_i32_1 : i32, i32, i32
  }
  func.func @transform_3(%arg0: i32) -> (i32, i32) {
    %c0_i32 = arith.constant 0 : i32
    %c0_i32_0 = arith.constant 0 : i32
    %c0_i32_1 = arith.constant 0 : i32
    return %c0_i32, %c0_i32_0 : i32, i32
  }
  func.func @transform_4(%arg0: i32) -> (i32, i32, i32) {
    %c0_i32 = arith.constant 0 : i32
    %c0_i32_0 = arith.constant 0 : i32
    %c0_i32_1 = arith.constant 0 : i32
    return %arg0, %c0_i32, %c0_i32_0 : i32, i32, i32
  }
  func.func @transform_5(%arg0: i32) -> (i32, i32, i32) {
    %c0_i32 = arith.constant 0 : i32
    %c0_i32_0 = arith.constant 0 : i32
    %c0_i32_1 = arith.constant 0 : i32
    return %arg0, %c0_i32, %c0_i32_0 : i32, i32, i32
  }
}

</mosaic_0001>

<bundles_post_ra>
// kernel: residual_block.5
= control target key start
LH: loop header
LB: loop body
LE: loop exit
PB: predicated region body
PF: predicated region fallthrough
CT: control target
= control target key end

     0   :  { %s319_s12 = smov 0   ;;  %s342_s0 = inlined_call_operand.vmem [shape: f32[2,8,128], index: 0, kind: input, shape index: {}]   ;;  %s343_s1 = inlined_call_operand.vmem [shape: f32[2,8,128], index: 1, kind: input, shape index: {}]   ;;  %s344_s2 = inlined_call_operand.vmem [shape: f32[8,2], index: 2, kind: input, shape index: {}]   ;;  %s345_s3 = inlined_call_operand.vmem [shape: f32[2,8,128], index: 3, kind: output, shape index: {}]  }
   0x1 LB: > { %s267_s13 = sadd.s32 4294967295, %s295_s12   ;;  %p271_p0 = scmp.ge.s32.totalorder %s295_s12, 1  ;;  %s295_s12 = sphi %s319_s12, %s13_s12  }
   0x2   : > { %p145_p1 = scmp.lt.s32.totalorder %s295_s12, 3 }
   0x4   : > { %p146_p2 = pnand %p271_p0, %p145_p1 }
   0x5   : > { %p171_p3 = scmp.lt.s32.totalorder (!%p146_p2), %s267_s13, 1 }
   0x6   : > { %149 = sbr.rel (%p146_p2) target bundleno = 150 (0x96), region = 32 }
   0xb   : > { %v183_v0 = vld [vmem:[%s344_s2] sm:$0xff]  ;;  %v297_v1 = vmov 0   ;;  %v298_v2 = vmov 1   ;;  %s347_s13 = smov (!%p171_p3, %s267_s13), 1 }
   0xc   : > { %287 = vset.pattern.permute.xlu0 %v297_v1  ;;  %s272_s16 = sshll.u32 %s347_s13, 3 }
   0xd   : > { %187 = vperm.xlu0 %287, %v183_v0   ;;  %s174_s19 = scalar_lea.vmem %s342_s0, %s272_s16  ;;  %s178_s22 = scalar_lea.vmem %s343_s1, %s272_s16 }
   0xe   : > { %v184_v4 = vld [vmem:[%s174_s19] sm:$0xff]  ;;  %s182_s25 = scalar_lea.vmem %s345_s3, %s272_s16 }
   0xf   : > { %v196_v7 = vld [vmem:[%s178_s22] sm:$0xff] }
  0x11   : > { %288 = vset.pattern.permute.xlu0 %v298_v2 }
  0x12   : > { %192 = vperm.xlu0 %288, %v183_v0  }
  0x88   : > { %v188_v3 = vpop.permute.xlu0 %187 }
  0x89   : > { %v190_v5 = vmul.f32 %v188_v3, %v184_v4 }
  0x8d   : > { %v193_v6 = vpop.permute.xlu0 %192 }
  0x8e   : > { %v195_v8 = vadd.f32 %v193_v6, %v190_v5 }
  0x90   : > { %v197_v9 = vadd.f32 %v196_v7, %v195_v8 }
  0x92   : > { %vm198_vm0 = vcmp.ge.f32.partialorder %v197_v9, 0.0  ;;  %v199_v10 = vmul.f32 0.2, %v197_v9 }
  0x94   : > { %v200_v11 = vsel %vm198_vm0, %v197_v9, %v199_v10 }
  0x95   : > { %201 = vst [vmem:[%s182_s25] sm:$0xff] %v200_v11 }
  0x96 PF: > { %s13_s12 = sadd.s32 1, %s295_s12  }
  0x97   : > { %p10_p4 = scmp.ge.s32.totalorder %s13_s12, 4  }
  0x99   :  { %12 = sbr.rel (!%p10_p4) target bundleno = 1 (0x1), region = 65 }

// kernel: residual_block.3
= control target key start
LH: loop header
LB: loop body
LE: loop exit
PB: predicated region body
PF: predicated region fallthrough
CT: control target
= control target key end

     0   :  { %s522_s9 = smov 0   ;;  %s560_s0 = inlined_call_operand.vmem [shape: f32[2,8,128], index: 0, kind: input, shape index: {}]   ;;  %s561_s1 = inlined_call_operand.vmem [shape: f32[3,8,8], index: 1, kind: input, shape index: {}]   ;;  %s562_s2 = inlined_call_operand.vmem [shape: f32[2,8,2], index: 2, kind: output, shape index: {}]  }
   0x1 LB: > { %s444_s10 = sadd.s32 4294967295, %s501_s9   ;;  %p448_p0 = scmp.ge.s32.totalorder %s501_s9, 1  ;;  %s501_s9 = sphi %s522_s9, %s12_s9  }
   0x2   : > { %p111_p1 = scmp.lt.s32.totalorder %s501_s9, 3 }
   0x4   : > { %p112_p2 = pnand %p448_p0, %p111_p1 }
   0x5   : > { %p131_p3 = scmp.lt.s32.totalorder (!%p112_p2), %s444_s10, 1  ;;  %s505_s17 = smov (!%p112_p2), 2  }
   0x6   : > { %115 = sbr.rel (%p112_p2) target bundleno = 476 (0x1dc), region = 28  ;;  %s506_s18 = smov (!%p112_p2), 126  }
   0xb   : > { %v503_v0 = vmov 0.0   ;;  %s564_s10 = smov (!%p131_p3, %s444_s10), 1  ;;  %vm504_vm0 = vmmov 0   ;;  %v451_v1 = vld [vmem:[%s561_s1 + $0x8] sm:$0xff]  ;;  %vm149_vm1 = vcmask 64512   ;;  %vm145_vm2 = vcmask 15360  }
   0xc   : > { %468 = vmatprep.subr.mxu0 %v503_v0  ;;  %473 = vmatprep.subr.mxu1 %v503_v0  ;;  %s449_s11 = sshll.u32 %s564_s10, 3  ;;  %vm453_vm3 = vmneg %vm145_vm2  ;;  %v140_v3 = vld [vmem:[%s561_s1] sm:$0xff]  ;;  %vm301_vm4 = vcmask 1031168   ;;  %v456_v5 = vld [vmem:[%s561_s1 + $0x10] sm:$0xff]  ;;  %v377_v9 = vlaneseq  ;;  %vm388_vm6 = vcmask 7168  }
   0xd   : > { %470 = vmatprep.mubr.msk.f32.mxu0 %vm504_vm0, %v503_v0  ;;  %475 = vmatprep.mubr.msk.f32.mxu1 %vm504_vm0, %v503_v0  ;;  %s134_s14 = scalar_lea.vmem %s560_s0, %s449_s11  ;;  %s138_s25 = scalar_lea.vmem %s562_s2, %s449_s11 }
   0xe   : > { %v139_v2 = vld [vmem:[%s134_s14] sm:$0xff]  ;;  %v378_v10 = vand.u32 127, %v377_v9 }
   0xf   : > { %142 = vrot.lane.b32.xlu0 %v139_v2, %s505_s17  ;;  %469 = vmatpush3.msra.mxu0 %v139_v2 }
  0x10   : > { %471 = vmatmul.mubr.msk.f32.vlgmr.msra.gmra.mxu0 %vm149_vm1, %v451_v1  ;;  %478 = vmatprep.subr.mxu0 %v503_v0  ;;  %vm379_vm5 = vcmp.lt.s32.totalorder %v378_v10, 16 }
  0x11   : > { %480 = vmatprep.mubr.msk.f32.mxu0 %vm504_vm0, %v503_v0  ;;  %v459_v15 = vsel %vm379_vm5, 1.0, %v503_v0 }
  0x13   : > { %298 = vrot.lane.b32.xlu0 %v139_v2, %s506_s18 }
  0x81   : > { %v143_v4 = vpop.permute.xlu0 %142 }
  0x82   : > { %474 = vmatpush3.msk.msra.mxu1 %vm453_vm3, %v143_v4 }
  0x83   : > { %476 = vmatmul.mubr.msk.f32.vlgmr.msra.gmra.mxu1 %vm149_vm1, %v140_v3 }
  0x85   : > { %v299_v6 = vpop.permute.xlu0 %298 }
  0x86   : > { %479 = vmatpush3.msk.msra.mxu0 %vm301_vm4, %v299_v6 }
  0x87   : > { %481 = vmatmul.mubr.msk.f32.vlgmr.msra.gmra.mxu0 %vm149_vm1, %v456_v5 }
  0xd0   : > { %v219_v7 = vpop.f32.mrf.mxu0 }
  0xd2   : > { %v472_v8 = vpop.f32.mrf.mxu0 }
 0x143   : > { %v292_v11 = vpop.f32.mrf.mxu1 }
 0x144   : > { %v293_v13 = vadd.f32 %v292_v11, %v219_v7 }
 0x145   : > { %v477_v12 = vpop.f32.mrf.mxu1 }
 0x147   : > { %v372_v14 = vpop.f32.mrf.mxu0 }
 0x148   : > { %v376_v16 = vadd.f32 %v372_v14, %v293_v13 }
 0x149   : > { %v482_v17 = vpop.f32.mrf.mxu0 }
 0x14a   : > { %v382_v18 = vmul.f32 %v459_v15, %v376_v16 }
 0x14c   : > { %383 = vadd.xlane.f32.xlu1 %v382_v18  ;;  %v385_v19 = vmul.f32 %v382_v18, %v382_v18 }
 0x150   : > { %386 = vadd.xlane.f32.xlu1 %v385_v19 }
 0x1d5   : > { %v384_v20 = vpop.xlane.xlu1 %383 }
 0x1d9   : > { %v387_v21 = vpop.xlane.xlu1 %386 }
 0x1da   : > { %v389_v22 = vsel %vm388_vm6, %v384_v20, %v387_v21 }
 0x1db   : > { %390 = vst.msk [vmem:[%s138_s25] sm:$0xff] %vm145_vm2, %v389_v22 }
 0x1dc PF: > { %s12_s9 = sadd.s32 1, %s501_s9  }
 0x1dd   : > { %p9_p4 = scmp.ge.s32.totalorder %s12_s9, 4  }
 0x1df   :  { %11 = sbr.rel (!%p9_p4) target bundleno = 1 (0x1), region = 60 }

// kernel: residual_block.4
= control target key start
LH: loop header
LB: loop body
LE: loop exit
PB: predicated region body
PF: predicated region fallthrough
CT: control target
= control target key end

     0   :  { %s948_s18 = smov 0   ;;  %s1035_s0 = inlined_call_operand.vmem [shape: f32[2,8,128], index: 0, kind: input, shape index: {}]   ;;  %s1036_s1 = inlined_call_operand.vmem [shape: f32[3,8,8], index: 1, kind: input, shape index: {}]   ;;  %s1037_s2 = inlined_call_operand.vmem [shape: f32[3,8,8], index: 2, kind: input, shape index: {}]   ;;  %s1038_s3 = inlined_call_operand.vmem [shape: f32[8,2], index: 3, kind: input, shape index: {}]   ;;  %s1039_s4 = inlined_call_operand.vmem [shape: f32[2,8,128], index: 4, kind: output, shape index: {0}]   ;;  %s1040_s5 = inlined_call_operand.vmem [shape: f32[2,8,2], index: 5, kind: output, shape index: {1}]  }
   0x1 LB: > { %s818_s19 = sadd.s32 4294967295, %s910_s18   ;;  %p822_p0 = scmp.ge.s32.totalorder %s910_s18, 1  ;;  %s910_s18 = sphi %s948_s18, %s16_s18  }
   0x2   : > { %p189_p1 = scmp.lt.s32.totalorder %s910_s18, 3 }
   0x4   : > { %p190_p2 = pnand %p822_p0, %p189_p1 }
   0x5   : > { %p219_p3 = scmp.lt.s32.totalorder (!%p190_p2), %s818_s19, 1  ;;  %s916_s28 = smov (!%p190_p2), 2  }
   0x6   : > { %193 = sbr.rel (%p190_p2) target bundleno = 796 (0x31c), region = 36  ;;  %s917_s29 = smov (!%p190_p2), 126  }
   0xb   : > { %v912_v0 = vmov 0.0   ;;  %vm913_vm0 = vmmov 0   ;;  %s1044_s19 = smov (!%p219_p3, %s818_s19), 1  ;;  %v474_v1 = vld [vmem:[%s1038_s3] sm:$0xff]  ;;  %v914_v2 = vmov 0   ;;  %v915_v3 = vmov 1  }
   0xc   : > { %857 = vmatprep.subr.mxu0 %v912_v0  ;;  %859 = vmatprep.mubr.msk.f32.mxu0 %vm913_vm0, %v912_v0  ;;  %s965_s22 = sshll.u32 %s1044_s19, 3  ;;  %v827_v4 = vld [vmem:[%s1036_s1 + $0x8] sm:$0xff]  ;;  %vm246_vm1 = vcmask 64512   ;;  %vm242_vm2 = vcmask 15360   ;;  %v237_v7 = vld [vmem:[%s1036_s1] sm:$0xff]  ;;  %vm398_vm4 = vcmask 1031168   ;;  %v231_v15 = vlaneseq }
   0xd   : > { %862 = vmatprep.subr.mxu1 %v912_v0  ;;  %864 = vmatprep.mubr.msk.f32.mxu1 %vm913_vm0, %v912_v0  ;;  %s222_s25 = scalar_lea.vmem %s1035_s0, %s965_s22  ;;  %vm981_vm3 = vmneg %vm242_vm2  ;;  %v832_v9 = vld [vmem:[%s1036_s1 + $0x10] sm:$0xff]  ;;  %v835_v29 = vld [vmem:[%s1037_s2 + $0x8] sm:$0xff]  ;;  %s226_s17 = scalar_lea.vmem %s1039_s4, %s965_s22  ;;  %vm731_vm7 = vcmask 7168  }
   0xe   : > { %901 = vset.pattern.permute.xlu1 %v914_v2  ;;  %903 = vset.pattern.permute.xlu0 %v915_v3  ;;  %v236_v5 = vld [vmem:[%s222_s25] sm:$0xff]  ;;  %v232_v19 = vand.u32 127, %v231_v15  ;;  %v840_v31 = vld [vmem:[%s1037_s2 + $0x10] sm:$0xff]  ;;  %s230_s21 = scalar_lea.vmem %s1040_s5, %s965_s22 }
   0xf   : > { %477 = vperm.xlu1 %901, %v474_v1   ;;  %239 = vrot.lane.b32.xlu0 %v236_v5, %s916_s28  ;;  %v490_v30 = vld [vmem:[%s1037_s2] sm:$0xff] }
  0x10   : > { %858 = vmatpush3.msra.mxu0 %v236_v5  ;;  %vm233_vm5 = vcmp.lt.s32.totalorder %v232_v19, 16 }
  0x11   : > { %860 = vmatmul.mubr.msk.f32.vlgmr.msra.gmra.mxu0 %vm246_vm1, %v827_v4  ;;  %867 = vmatprep.subr.mxu0 %v912_v0  ;;  %v826_v26 = vsel %vm233_vm5, 1.0, %v912_v0 }
  0x12   : > { %869 = vmatprep.mubr.msk.f32.mxu0 %vm913_vm0, %v912_v0 }
  0x13   : > { %902 = vset.pattern.permute.xlu1 %v915_v3  ;;  %395 = vrot.lane.b32.xlu0 %v236_v5, %s917_s29 }
  0x14   : > { %482 = vperm.xlu1 %902, %v474_v1  }
  0x81   : > { %v240_v8 = vpop.permute.xlu0 %239 }
  0x82   : > { %863 = vmatpush3.msk.msra.mxu1 %vm981_vm3, %v240_v8 }
  0x83   : > { %865 = vmatmul.mubr.msk.f32.vlgmr.msra.gmra.mxu1 %vm246_vm1, %v237_v7  ;;  %872 = vmatprep.subr.mxu1 %v912_v0 }
  0x84   : > { %874 = vmatprep.mubr.msk.f32.mxu1 %vm913_vm0, %v912_v0 }
  0x85   : > { %v396_v10 = vpop.permute.xlu0 %395 }
  0x86   : > { %868 = vmatpush3.msk.msra.mxu0 %vm398_vm4, %v396_v10 }
  0x87   : > { %870 = vmatmul.mubr.msk.f32.vlgmr.msra.gmra.mxu0 %vm246_vm1, %v832_v9  ;;  %877 = vmatprep.subr.mxu0 %v912_v0 }
  0x88   : > { %879 = vmatprep.mubr.msk.f32.mxu0 %vm913_vm0, %v912_v0 }
  0x8a   : > { %v478_v14 = vpop.permute.xlu1 %477 }
  0x8f   : > { %v483_v22 = vpop.permute.xlu1 %482 }
  0xd1   : > { %v316_v11 = vpop.f32.mrf.mxu0 }
  0xd3   : > { %v861_v12 = vpop.f32.mrf.mxu0 }
 0x143   : > { %v389_v13 = vpop.f32.mrf.mxu1 }
 0x144   : > { %v390_v17 = vadd.f32 %v389_v13, %v316_v11 }
 0x145   : > { %v866_v16 = vpop.f32.mrf.mxu1 }
 0x147   : > { %v469_v18 = vpop.f32.mrf.mxu0 }
 0x148   : > { %v473_v20 = vadd.f32 %v469_v18, %v390_v17 }
 0x149   : > { %v871_v21 = vpop.f32.mrf.mxu0 }
 0x14a   : > { %v480_v23 = vmul.f32 %v478_v14, %v473_v20 }
 0x14c   : > { %v485_v24 = vadd.f32 %v483_v22, %v480_v23 }
 0x14e   : > { %vm486_vm6 = vcmp.ge.f32.partialorder %v485_v24, 0.0  ;;  %v487_v25 = vmul.f32 0.2, %v485_v24 }
 0x150   : > { %v488_v27 = vsel %vm486_vm6, %v485_v24, %v487_v25 }
 0x151   : > { %v489_v28 = vmul.f32 %v826_v26, %v488_v27 }
 0x153   : > { %646 = vrot.lane.b32.xlu1 %v489_v28, %s917_s29  ;;  %492 = vrot.lane.b32.xlu0 %v489_v28, %s916_s28 }
 0x154   : > { %873 = vmatpush3.msra.mxu1 %v489_v28 }
 0x155   : > { %875 = vmatmul.mubr.msk.f32.vlgmr.msra.gmra.mxu1 %vm246_vm1, %v835_v29  ;;  %882 = vmatprep.subr.mxu1 %v912_v0 }
 0x156   : > { %884 = vmatprep.mubr.msk.f32.mxu1 %vm913_vm0, %v912_v0 }
 0x1c5   : > { %v647_v32 = vpop.permute.xlu1 %646  ;;  %v493_v33 = vpop.permute.xlu0 %492 }
 0x1c6   : > { %878 = vmatpush3.msk.msra.mxu0 %vm981_vm3, %v493_v33  ;;  %883 = vmatpush3.msk.msra.mxu1 %vm398_vm4, %v647_v32 }
 0x1c7   : > { %880 = vmatmul.mubr.msk.f32.vlgmr.msra.gmra.mxu0 %vm246_vm1, %v490_v30  ;;  %885 = vmatmul.mubr.msk.f32.vlgmr.msra.gmra.mxu1 %vm246_vm1, %v840_v31 }
 0x215   : > { %v567_v34 = vpop.f32.mrf.mxu1 }
 0x217   : > { %v876_v35 = vpop.f32.mrf.mxu1 }
 0x287   : > { %v640_v36 = vpop.f32.mrf.mxu0  ;;  %v719_v37 = vpop.f32.mrf.mxu1 }
 0x288   : > { %v641_v38 = vadd.f32 %v640_v36, %v567_v34 }
 0x289   : > { %v881_v39 = vpop.f32.mrf.mxu0  ;;  %v886_v40 = vpop.f32.mrf.mxu1 }
 0x28a   : > { %v723_v41 = vadd.f32 %v719_v37, %v641_v38 }
 0x28c   : > { %v724_v42 = vmul.f32 %v826_v26, %v723_v41 }
 0x28e   : > { %725 = vst [vmem:[%s226_s17] sm:$0xff] %v724_v42  ;;  %726 = vadd.xlane.f32.xlu0 %v724_v42  ;;  %v728_v43 = vmul.f32 %v724_v42, %v724_v42 }
 0x290   : > { %729 = vadd.xlane.f32.xlu1 %v728_v43 }
 0x317   : > { %v727_v44 = vpop.xlane.xlu0 %726 }
 0x319   : > { %v730_v45 = vpop.xlane.xlu1 %729 }
 0x31a   : > { %v732_v46 = vsel %vm731_vm7, %v727_v44, %v730_v45 }
 0x31b   : > { %733 = vst.msk [vmem:[%s230_s21] sm:$0xff] %vm242_vm2, %v732_v46 }
 0x31c PF: > { %s16_s18 = sadd.s32 1, %s910_s18  }
 0x31d   : > { %p13_p4 = scmp.ge.s32.totalorder %s16_s18, 4  }
 0x31f   :  { %15 = sbr.rel (!%p13_p4) target bundleno = 1 (0x1), region = 82 }

</bundles_post_ra>
